<compile_context>
chip_gen: v6e
topology: v6e:2x2x1
jax: 0.10.0
libtpu: 0.0.40
codegen_flags: <defaults>
</compile_context>

<pallas_src>
import jax
import jax.numpy as jnp
from jax import lax
from jax.experimental import pallas as pl
from jax.experimental.pallas import tpu as pltpu


def _rmsnorm_kernel(scale):
    def kernel(x_ref, g_ref, o_ref):
        x = x_ref[...].astype(jnp.float32)              # (C, TN)
        g = g_ref[...].astype(jnp.float32)              # (C, 1)
        ss = jnp.sum(x * x, axis=0, keepdims=True)      # (1, TN)
        # 1 / max(||x||_2, 1e-12)  ==  min(rsqrt(ss), 1e12).  rsqrt runs on the
        # EUP (its own VLIW slot); the divide becomes a broadcast multiply.
        inv = jnp.minimum(lax.rsqrt(ss), 1e12) * scale  # scale folded into the row
        o_ref[...] = (x * inv * g).astype(o_ref.dtype)
    return kernel


def rmsnorm(x, g, *, tn_max=1024):
    """x: (B, C, N), g: (1, C, 1). Returns same shape/dtype as x."""
    B, C, N = x.shape
    scale = float(C) ** 0.5

    # Pick a lane-dense tile width TN (multiple of 128) that keeps the
    # double-buffered x + out blocks plus f32 temporaries comfortably inside
    # the smallest scoped-VMEM budget across v5e / v6e / v7x.
    itemsize = jnp.dtype(x.dtype).itemsize
    budget = 8 * 1024 * 1024                       # ~8 MiB: safe on v5e's 16 MiB default
    tn = tn_max
    while tn > 128 and C * tn * (4 * itemsize + 8) > budget:
        tn //= 2
    tn = min(tn, pl.cdiv(N, 128) * 128)            # don't over-tile tiny N
    n_pad = pl.cdiv(N, tn) * tn

    x_in = x if n_pad == N else jnp.pad(x, ((0, 0), (0, 0), (0, n_pad - N)))

    out = pl.pallas_call(
        _rmsnorm_kernel(scale),
        out_shape=jax.ShapeDtypeStruct((B, C, n_pad), x.dtype),
        grid_spec=pltpu.PrefetchScalarGridSpec(
            num_scalar_prefetch=0,
            grid=(B, n_pad // tn),
            in_specs=[
                # batch dim squeezed -> kernel sees a clean 2-D (C, TN) tile
                pl.BlockSpec((None, C, tn), lambda b, n: (b, 0, n)),
                pl.BlockSpec((None, C, 1), lambda b, n: (0, 0, 0)),
            ],
            out_specs=pl.BlockSpec((None, C, tn), lambda b, n: (b, 0, n)),
        ),
        compiler_params=pltpu.CompilerParams(
            dimension_semantics=("parallel", "parallel"),
            vmem_limit_bytes=32 * 1024 * 1024,
        ),
    )(x_in, g)

    if n_pad != N:
        out = out[:, :, :N]
    return out


if __name__ == "__main__":
    key = jax.random.PRNGKey(0)
    B, C, N = 2, 32, 16                              # (batch, dim, points)
    x = jax.random.normal(key, (B, C, N), dtype=jnp.float32)
    g = jnp.ones((1, C, 1), dtype=jnp.float32)       # nn.Parameter(torch.ones(1, dim, 1))

    out = rmsnorm(x, g)
    jax.block_until_ready(out)

    # Pure-JAX reference of the PyTorch semantics: F.normalize(x, dim=1) * g * sqrt(C)
    norm = jnp.sqrt(jnp.sum(x * x, axis=1, keepdims=True))
    ref = x / jnp.maximum(norm, 1e-12) * g * (C ** 0.5)
    assert out.shape == x.shape and out.dtype == x.dtype
    assert jnp.allclose(out, ref, atol=1e-5, rtol=1e-5)

    print("KERNEL_OK")
</pallas_src>

<mosaic_0001>
module attributes {stable_mosaic.version = 11 : i64} {
  func.func @kernel(%arg0: i32, %arg1: i32, %arg2: memref<1x32x128xf32, #tpu.memory_space<vmem>>, %arg3: memref<1x32x1xf32, #tpu.memory_space<vmem>>, %arg4: memref<1x32x128xf32, #tpu.memory_space<vmem>>) attributes {dimension_semantics = [#tpu.dimension_semantics<parallel>, #tpu.dimension_semantics<parallel>], iteration_bounds = array<i64: 2, 1>, scalar_prefetch = 0 : i64, scratch_operands = 0 : i64, tpu.core_type = #tpu.core_type<tc>, window_params = [{transform_indices = @transform_0, window_bounds = array<i64: 1, 32, 128>}, {pipeline_mode = #tpu.pipeline_mode<synchronous>, transform_indices = @transform_1, window_bounds = array<i64: 1, 32, 1>}, {transform_indices = @transform_2, window_bounds = array<i64: 1, 32, 128>}]} {
    %c0 = arith.constant 0 : index
    %c0_0 = arith.constant 0 : index
    %c0_1 = arith.constant 0 : index
    %0 = vector.load %arg2[%c0, %c0_0, %c0_1] : memref<1x32x128xf32, #tpu.memory_space<vmem>>, vector<1x32x128xf32>
    %1 = vector.shape_cast %0 : vector<1x32x128xf32> to vector<32x128xf32>
    %c0_2 = arith.constant 0 : index
    %c0_3 = arith.constant 0 : index
    %c0_4 = arith.constant 0 : index
    %2 = vector.load %arg3[%c0_2, %c0_3, %c0_4] : memref<1x32x1xf32, #tpu.memory_space<vmem>>, vector<1x32x1xf32>
    %3 = vector.shape_cast %2 : vector<1x32x1xf32> to vector<32x1xf32>
    %4 = arith.mulf %1, %1 : vector<32x128xf32>
    %cst = arith.constant dense<0.000000e+00> : vector<128xf32>
    %5 = vector.multi_reduction <add>, %4, %cst [0] : vector<32x128xf32> to vector<128xf32>
    %6 = vector.shape_cast %5 : vector<128xf32> to vector<1x128xf32>
    %7 = math.rsqrt %6 : vector<1x128xf32>
    %cst_5 = arith.constant 9.99999995E+11 : f32
    %8 = vector.broadcast %cst_5 : f32 to vector<1x128xf32>
    %9 = arith.minimumf %7, %8 : vector<1x128xf32>
    %cst_6 = arith.constant 5.65685415 : f32
    %10 = vector.broadcast %cst_6 : f32 to vector<1x128xf32>
    %11 = arith.mulf %9, %10 : vector<1x128xf32>
    %12 = vector.broadcast %11 : vector<1x128xf32> to vector<32x128xf32>
    %13 = arith.mulf %1, %12 : vector<32x128xf32>
    %14 = vector.broadcast %3 : vector<32x1xf32> to vector<32x128xf32>
    %15 = arith.mulf %13, %14 : vector<32x128xf32>
    %c0_7 = arith.constant 0 : index
    %c0_8 = arith.constant 0 : index
    %c0_9 = arith.constant 0 : index
    %16 = vector.load %arg4[%c0_7, %c0_8, %c0_9] : memref<1x32x128xf32, #tpu.memory_space<vmem>>, vector<1x32x128xf32>
    %17 = vector.shape_cast %16 : vector<1x32x128xf32> to vector<32x128xf32>
    %18 = vector.shape_cast %15 : vector<32x128xf32> to vector<1x32x128xf32>
    tpu.vector_store %arg4[%c0_7, %c0_8, %c0_9], %18 {strides = array<i32>} : memref<1x32x128xf32, #tpu.memory_space<vmem>>, vector<1x32x128xf32>,
    return
  }
  func.func @transform_0(%arg0: i32, %arg1: i32) -> (i32, i32, i32) {
    %c0_i32 = arith.constant 0 : i32
    %c0_i32_0 = arith.constant 0 : i32
    return %arg0, %c0_i32, %arg1 : i32, i32, i32
  }
  func.func @transform_1(%arg0: i32, %arg1: i32) -> (i32, i32, i32) {
    %c0_i32 = arith.constant 0 : i32
    %c0_i32_0 = arith.constant 0 : i32
    %c0_i32_1 = arith.constant 0 : i32
    %c0_i32_2 = arith.constant 0 : i32
    return %c0_i32, %c0_i32_0, %c0_i32_1 : i32, i32, i32
  }
  func.func @transform_2(%arg0: i32, %arg1: i32) -> (i32, i32, i32) {
    %c0_i32 = arith.constant 0 : i32
    %c0_i32_0 = arith.constant 0 : i32
    return %arg0, %c0_i32, %arg1 : i32, i32, i32
  }
}

</mosaic_0001>

<bundles_post_ra>
// kernel: tpu_custom_call.1
= control target key start
LH: loop header
LB: loop body
LE: loop exit
PB: predicated region body
PF: predicated region fallthrough
CT: control target
= control target key end

     0   :  { %7 = vsyncpa [#allocation3], 0  ;;  %s717_s0 = inlined_call_operand.hbm [shape: f32[2,32,128], index: 0, kind: input, shape index: {}]   ;;  %s718_s1 = inlined_call_operand.vmem [shape: f32[1,32,1], index: 1, kind: input, shape index: {}]   ;;  %s719_s2 = inlined_call_operand.hbm [shape: f32[2,32,128], index: 2, kind: output, shape index: {}]  }
   0x1   :  { %9 = vsyncpa [#allocation3 + $0x1], 0 }
   0x2   :  { %10 = vsyncpa [#allocation4], 0 }
   0x3   :  { %12 = vsyncpa [#allocation4 + $0x1], 0  ;;  %s555_s9 = smov 0   ;;  %s557_s10 = smov 0  }
   0x4   :  { %s559_s11 = smov 0   ;;  %s561_s12 = smov 0  }
   0x5   :  { %s563_s13 = smov 0   ;;  %s565_s14 = smov 0  }
   0x6 LB: > { %s335_s15 = sadd.s32 4294967295, %s531_s14   ;;  %s336_s16 = sadd.s32 4294967294, %s531_s14   ;;  %s531_s14 = sphi %s565_s14, %s18_s14   ;;  %s527_s13 = sphi %s563_s13, %s730_s13   ;;  %s523_s12 = sphi %s561_s12, %s729_s12   ;;  %s519_s11 = sphi %s559_s11, %s728_s11   ;;  %s515_s10 = sphi %s557_s10, %s727_s10   ;;  %s511_s9 = sphi %s555_s9, %s726_s9  }
   0x7   : > { %s30_s17 = sadd.s32 1, %s527_s13  ;;  %s39_s18 = sadd.s32 1, %s519_s11 }
   0x8   : > { %p32_p0 = scmp.ge.s32.totalorder %s30_s17, 2  ;;  %p46_p1 = scmp.ne.s32.totalorder %s519_s11, %s515_s10 }
   0x9   : > { %p47_p2 = scmp.eq.s32.totalorder %s531_s14, 0  ;;  %p52_p3 = scmp.ne.s32.totalorder %s515_s10, %s511_s9 }
   0xa   : > { %s732_s17 = smov (%p32_p0, %s30_s17), 0  ;;  %p53_p5 = scmp.eq.s32.totalorder %s335_s15, 0 }
   0xb   : > { %p596_p4 = por %p47_p2, %p46_p1  ;;  %s34_s20 = ssub.s32 %s527_s13, %s732_s17 }
   0xc   : > { %p99_p6 = scmp.eq.s32.totalorder %s335_s15, 1  ;;  %p37_p7 = scmp.eq.s32.totalorder %s34_s20, 0 }
   0xd   : > { %p602_p8 = por %p53_p5, %p52_p3  ;;  %p105_p10 = scmp.eq.s32.totalorder %s336_s16, 1 }
   0xe   : > { %p606_p9 = por %p99_p6, %p46_p1  ;;  %p364_p13 = scmp.lt.s32.totalorder %s531_s14, 2 }
   0xf   : > { %s611_s23 = scalar_select %p37_p7, %s519_s11, %s39_s18  }
  0x10   : > { %p613_p11 = por %p105_p10, %p52_p3  ;;  %s128_s25 = sand.u32 1, %s519_s11  }
  0x11   : > { %s339_s26 = sshll.u32 %s128_s25, 5  ;;  %s350_s27 = sshll.u32 %s527_s13, 9 }
  0x12   : > { %s139_s30 = scalar_lea.hbm %s717_s0, %s350_s27  ;;  %s132_s3 = scalar_lea.vmem [#allocation2], %s339_s26 }
  0x13   : > { %s140_s4 = sshll.u32 %s132_s3, 4  ;;  %p626_p0 = pnand %p364_p13, %p596_p4  ;;  %s141_s4 = int_to_ptr.vmem [resolvable:$true] %s140_s4 }
  0x14   : > { %p342_p1 = scmp.ge.s32.totalorder %s531_s14, 1  ;;  %s129_s6 = scalar_lea.sflag [#allocation3], %s128_s25 }
  0x15   : > { %p425_p2 = pneg %p626_p0  ;;  %s436_s7 = scalar_lea.vmem %s141_s4, 512 }
  0x16   : > { %p437_p3 = scmp.ne.s32.totalorder %s141_s4, %s436_s7  ;;  %s533_s8 = smov [#allocation2]  }
  0x17   : > { %s441_s15 = sshll.u32 %s533_s8, 4  ;;  %s442_s15 = int_to_ptr.vmem [resolvable:$false] %s441_s15 }
  0x18   : > { %p439_p5 = pnand %p437_p3, %p425_p2  ;;  %s443_s16 = scalar_lea.vmem %s442_s15, 1024 }
  0x19   : > { %p444_p7 = scmp.lt.s32.totalorder %s141_s4, %s442_s15  ;;  %p445_p10 = scmp.lt.s32.totalorder %s443_s16, %s436_s7 }
  0x1a   : > { %p440_p6 = pneg %p439_p5 }
  0x1b   : > { %p446_p12 = por %p445_p10, %p444_p7 }
  0x1d   : > { %p447_p4 = pnand %p446_p12, %p440_p6 }
  0x1f   : > { %450 = shalt.err (!%p447_p4)
}
  0x20   : > { %s534_s18 = smov 128   ;;  %s535_s19 = smov 8  }
  0x21   : > { %359 = dma.hbm_to_vmem [thread:$0]  (!%p626_p0), %s139_s30, 512, %s141_s4, %s129_s6, %s534_s18, %s534_s18, %s535_s19  }
  0x22   : > { %p148_p13 = scmp.lt.s32.totalorder %s531_s14, 3 }
  0x24   : > { %p149_p2 = pnand %p342_p1, %p148_p13 }
  0x25   : > { %s639_s20 = sand.u32 (!%p149_p2), 1, %s515_s10  }
  0x26   : > { %152 = sbr.rel (%p149_p2) target bundleno = 190 (0xbe), region = 28  ;;  %s343_s25 = sshll.u32 (!%p149_p2), %s639_s20, 5 }
  0x27   : > { %s155_s26 = scalar_lea.sflag (!%p149_p2), [#allocation3], %s639_s20  ;;  %s158_s27 = scalar_lea.vmem (!%p149_p2), [#allocation2], %s343_s25 }
  0x2b   : > { %502 = dma.done.wait (%p602_p8), %s155_s26, 512  }
  0x2c   : > { %504 = vsyncadd (%p602_p8), %s155_s26, 4294966784  ;;  %v536_v0 = vmov 0   ;;  %v185_v1 = vld [vmem:[%s718_s1 + $0x10] sm:$0xff]  ;;  %v183_v2 = vld [vmem:[%s718_s1] sm:$0xff]  ;;  %s178_s7 = scalar_lea.vmem [#allocation5], %s343_s25  ;;  %s351_s15 = sshll.u32 %s523_s12, 9 }
  0x2d   : > { %420 = vset.pattern.permute.xlu1 %v536_v0  ;;  %419 = vset.pattern.permute.xlu0 %v536_v0  ;;  %v186_v3 = vld [vmem:[%s718_s1 + $0x18] sm:$0xff]  ;;  %v184_v4 = vld [vmem:[%s718_s1 + $0x8] sm:$0xff]  ;;  %v179_v5 = vld [vmem:[%s158_s27] sm:$0xff]  ;;  %s250_s8 = sshll.u32 %s178_s7, 4  ;;  %s669_s19 = scalar_lea.hbm %s719_s2, %s351_s15  ;;  %s664_s8 = int_to_ptr.vmem [resolvable:$true] %s250_s8 }
  0x2e   : > { %219 = vperm.xlu1 %420, %v185_v1   ;;  %209 = vperm.xlu0 %419, %v183_v2   ;;  %v180_v6 = vld [vmem:[%s158_s27 + $0x8] sm:$0xff]  ;;  %v187_v7 = vmul.f32 %v179_v5, %v179_v5  ;;  %v181_v9 = vld [vmem:[%s158_s27 + $0x10] sm:$0xff]  ;;  %v182_v12 = vld [vmem:[%s158_s27 + $0x18] sm:$0xff]  ;;  %s236_s25 = scalar_lea.sflag [#allocation4], %s639_s20  ;;  %s451_s12 = scalar_lea.vmem %s664_s8, 512 }
  0x2f   : > { %v188_v8 = vmul.f32 %v180_v6, %v180_v6  ;;  %v189_v10 = vmul.f32 %v181_v9, %v181_v9  ;;  %v190_v13 = vmul.f32 %v182_v12, %v182_v12  ;;  %p452_p8 = scmp.ne.s32.totalorder %s664_s8, %s451_s12  ;;  %s537_s26 = smov [#allocation5]  }
  0x30   : > { %s455_s27 = sshll.u32 %s537_s26, 4  ;;  %s456_s27 = int_to_ptr.vmem [resolvable:$false] %s455_s27 }
  0x31   : > { %v191_v11 = vadd.f32 %v188_v8, %v187_v7  ;;  %p453_p12 = pnand %p452_p8, %p606_p9  ;;  %s457_s28 = scalar_lea.vmem %s456_s27, 1024 }
  0x32   : > { %224 = vperm.xlu1 %420, %v186_v3   ;;  %214 = vperm.xlu0 %419, %v184_v4   ;;  %p458_p1 = scmp.lt.s32.totalorder %s664_s8, %s456_s27  ;;  %p459_p3 = scmp.lt.s32.totalorder %s457_s28, %s451_s12 }
  0x33   : > { %v192_v14 = vadd.f32 %v191_v11, %v189_v10  ;;  %p454_p0 = pneg %p453_p12 }
  0x34   : > { %p460_p5 = por %p459_p3, %p458_p1 }
  0x35   : > { %v193_v15 = vadd.f32 %v192_v14, %v190_v13 }
  0x36   : > { %p461_p6 = pnand %p460_p5, %p454_p0 }
  0x37   : > { %v194_v16 = vrot.slane %v193_v15, 4 }
  0x39   : > { %v195_v17 = vadd.f32 %v194_v16, %v193_v15 }
  0x3b   : > { %v196_v18 = vrot.slane %v195_v17, 2 }
  0x3d   : > { %v197_v19 = vadd.f32 %v196_v18, %v195_v17 }
  0x3f   : > { %v198_v20 = vrot.slane %v197_v19, 1 }
  0x41   : > { %v199_v21 = vadd.f32 %v198_v20, %v197_v19 }
  0x43   : > { %421 = vrsqrt.f32 %v199_v21 }
  0x50   : > { %v422_v22 = vpop.eup %421 }
  0x51   : > { %v201_v23 = vmin.f32 %v422_v22, 1e+12 }
  0x53   : > { %v202_v24 = vmul.f32 5.656854, %v201_v23 }
  0x55   : > { %v205_v25 = vmul.f32 %v202_v24, %v181_v9  ;;  %v203_v26 = vmul.f32 %v202_v24, %v179_v5  ;;  %v206_v31 = vmul.f32 %v202_v24, %v182_v12  ;;  %v204_v32 = vmul.f32 %v202_v24, %v180_v6 }
  0xa9   : > { %v220_v27 = vpop.permute.xlu1 %219  ;;  %v210_v28 = vpop.permute.xlu0 %209 }
  0xaa   : > { %v229_v29 = vmul.f32 %v220_v27, %v205_v25  ;;  %v227_v30 = vmul.f32 %v210_v28, %v203_v26 }
  0xac   : > { %233 = vst [vmem:[%s178_s7 + $0x10] sm:$0xff] %v229_v29  ;;  %231 = vst [vmem:[%s178_s7] sm:$0xff] %v227_v30 }
  0xad   : > { %v225_v33 = vpop.permute.xlu1 %224  ;;  %v215_v34 = vpop.permute.xlu0 %214 }
  0xae   : > { %v230_v35 = vmul.f32 %v225_v33, %v206_v31  ;;  %v228_v36 = vmul.f32 %v215_v34, %v204_v32 }
  0xb0   : > { %234 = vst [vmem:[%s178_s7 + $0x18] sm:$0xff] %v230_v35  ;;  %232 = vst [vmem:[%s178_s7 + $0x8] sm:$0xff] %v228_v36 }
  0xb1   : > { %464 = shalt.err (!%p461_p6)
}
  0xb2   : > { %s465_s29 = scalar_lea.hbm %s669_s19, 512  ;;  %s469_s4 = scalar_lea.hbm %s719_s2, 1024 }
  0xb3   : > { %p466_p7 = scmp.ne.s32.totalorder %s669_s19, %s465_s29  ;;  %p470_p13 = scmp.lt.s32.totalorder %s669_s19, %s719_s2 }
  0xb4   : > { %p471_p2 = scmp.lt.s32.totalorder %s469_s4, %s465_s29 }
  0xb5   : > { %p467_p10 = pnand %p466_p7, %p606_p9 }
  0xb6   : > { %p472_p8 = por %p471_p2, %p470_p13 }
  0xb7   : > { %p468_p4 = pneg %p467_p10 }
  0xb9   : > { %p473_p12 = pnand %p472_p8, %p468_p4 }
  0xbb   : > { %476 = shalt.err (!%p473_p12)
}
  0xbc   : > { %s538_s21 = smov 128   ;;  %s539_s7 = smov 8  }
  0xbd   : > { %354 = dma.vmem_to_hbm [thread:$0]  (%p606_p9), %s664_s8, 512, %s669_s19, %s236_s25, %s538_s21, %s538_s21, %s539_s7  }
  0xbe PF: > { %s265_s15 = sand.u32 1, %s511_s9   ;;  %p725_p0 = scmp.ge.s32.totalorder %s531_s14, 2 }
  0xbf   : > { %s266_s16 = scalar_lea.sflag [#allocation4], %s265_s15 }
  0xc0   : > { %p361_p1 = pnand %p725_p0, %p613_p11 }
  0xc2   : > { %p362_p3 = pneg %p361_p1 }
  0xc4   : > { %506 = dma.done.wait (%p362_p3), %s266_s16, 512  }
  0xc5   : > { %508 = vsyncadd (%p362_p3), %s266_s16, 4294966784  ;;  %s18_s14 = sadd.s32 1, %s531_s14   ;;  %s726_s9 = smov %s515_s10 }
  0xc6   : > { %p15_p5 = scmp.ge.s32.totalorder %s18_s14, 4   ;;  %s727_s10 = smov %s519_s11 }
  0xc7   : > { %s728_s11 = smov %s611_s23  ;;  %s729_s12 = smov %s527_s13 }
  0xc8   : > { %s730_s13 = smov %s732_s17  ;;  %17 = sbr.rel (!%p15_p5) target bundleno = 6 (0x6), region = 73 }
  0xcd   :  { %271 = vsyncpa [#allocation3], 1 }
  0xce   :  { %273 = vsyncpa [#allocation3 + $0x1], 1 }
  0xcf   :  { %274 = vsyncpa [#allocation4], 1 }
  0xd0   :  { %276 = vsyncpa [#allocation4 + $0x1], 1 }

</bundles_post_ra>
